<compile_context>
chip_gen: v7x
topology: tpu7x:2x2x1
jax: 0.10.0
libtpu: 0.0.40
codegen_flags: <defaults>
</compile_context>

<pallas_src>
import functools

import jax
import jax.numpy as jnp
from jax.experimental import pallas as pl
from jax.experimental.pallas import tpu as pltpu


def _round_up(a: int, b: int) -> int:
    return (a + b - 1) // b * b


def _make_conv_kernel(K, stride, dilation, tt, TM, HH):
    """One grid step == one (batch, time-tile) output block."""

    def kernel(x_ref, halo_ref, w_ref, b_ref, o_ref, win_ref):
        # Assemble the haloed input window for this tile in VMEM:
        #   rows [0, TM)        <- this tile's own rows of padded x
        #   rows [TM, TM + HH)  <- halo rows (start of the next tile's rows)
        win_ref[0:TM, :] = x_ref[0]
        win_ref[TM:TM + HH, :] = halo_ref[0]

        # K is small and static: fully unrolled tap loop accumulating in vregs.
        acc = None
        for k in range(K):
            start = k * dilation
            if stride == 1:
                tap = win_ref[start:start + tt, :]                 # (tt, C_in)
            else:
                # strided row selection for stride > 1 (not hit by the demo)
                tap = win_ref[pl.ds(start, tt, stride=stride), :]
            part = jnp.dot(tap, w_ref[k], preferred_element_type=jnp.float32)
            acc = part if acc is None else acc + part

        # Single fused bias-add + store per tile.
        # TODO(synk): C_out=16 makes this a lane-masked store; a lane-dense
        # repack (tt,16)->(tt/8,128) is a possible further micro-opt.
        o_ref[0] = (acc + b_ref[...]).astype(o_ref.dtype)

    return kernel


@functools.partial(jax.jit, static_argnames=("stride", "padding", "dilation"))
def conv_layer_forward(x, weight, bias, *, stride=1, padding=0, dilation=1):
    """Equivalent of Conv_layer.forward.

    Args:
      x:      (B, T, C_in)       any float dtype (cast to f32, matching `.float()`).
      weight: (C_out, C_in, K)   PyTorch Conv1d weight layout.
      bias:   (C_out,)
    Returns:
      (B, T_out, C_out) float32.
    """
    x = x.astype(jnp.float32)
    weight = weight.astype(jnp.float32)
    bias = bias.astype(jnp.float32)

    B, T, C_in = x.shape
    C_out, C_in_w, K = weight.shape
    assert C_in == C_in_w

    T_out = (T + 2 * padding - dilation * (K - 1) - 1) // stride + 1
    assert T_out > 0

    # Halo rows needed beyond each tile's own stride-aligned input rows.
    halo = max(0, dilation * (K - 1) + 1 - stride)
    HH = _round_up(max(halo, 1), 8)           # halo block, sublane-aligned

    # Pick the time-tile size: as large as a modest per-tile VMEM budget allows
    # (big tiles amortize the ~0.35us/grid-step overhead on all of v5e/v6e/v7x),
    # clamped to the padded output length, and a multiple of HH so the halo
    # block's element offset is an integer block index.
    def _vmem_est(tt_):
        TM_ = tt_ * stride
        return 4 * (2 * (TM_ + HH) * C_in      # x main + halo (double-buffered)
                    + 2 * tt_ * C_out          # output tile   (double-buffered)
                    + (TM_ + HH) * C_in        # window scratch
                    + K * C_in * C_out + C_out)

    tt = 4096
    while tt > 64 and _vmem_est(tt) > (6 << 20):
        tt //= 2
    tt = min(tt, _round_up(T_out, 8))
    tt = max(_round_up(tt, HH), 8)

    TM = tt * stride                           # padded-input rows per tile
    T_out_pad = _round_up(T_out, tt)
    num_t = T_out_pad // tt

    # Zero-pad the input once: conv padding on the left, and enough on the right
    # so every main block AND the last halo block read fully in-bounds zeros.
    T_x_pad = max(num_t * TM + HH, T + 2 * padding)
    x_pad = jnp.pad(x, ((0, 0), (padding, T_x_pad - T - padding), (0, 0)))

    # Per-tap weight matrices: w_taps[k, ci, co] = weight[co, ci, k].
    w_taps = jnp.transpose(weight, (2, 1, 0))          # (K, C_in, C_out)
    bias2d = bias.reshape(1, C_out)

    kernel = _make_conv_kernel(K, stride, dilation, tt, TM, HH)

    out = pl.pallas_call(
        kernel,
        out_shape=jax.ShapeDtypeStruct((B, T_out_pad, C_out), jnp.float32),
        grid=(B, num_t),
        in_specs=[
            # main rows of this tile: start = j * TM
            pl.BlockSpec((1, TM, C_in), lambda b, j: (b, j, 0)),
            # halo rows: start = (j + 1) * TM  (TM is a multiple of HH)
            pl.BlockSpec((1, HH, C_in), lambda b, j: (b, (j + 1) * (TM // HH), 0)),
            # per-tap weights + bias: resident, constant block index
            pl.BlockSpec((K, C_in, C_out), lambda b, j: (0, 0, 0)),
            pl.BlockSpec((1, C_out), lambda b, j: (0, 0)),
        ],
        out_specs=pl.BlockSpec((1, tt, C_out), lambda b, j: (b, j, 0)),
        scratch_shapes=[pltpu.VMEM((TM + HH, C_in), jnp.float32)],
        compiler_params=pltpu.CompilerParams(
            dimension_semantics=("parallel", "parallel")),
    )(x_pad, x_pad, w_taps, bias2d)

    return out[:, :T_out, :]


def _reference_conv1d(x, weight, bias, *, stride=1, padding=0, dilation=1):
    """Pure-JAX reference mirroring torch Conv1d on (B, C_in, T) after transpose."""
    x_nct = jnp.transpose(x.astype(jnp.float32), (0, 2, 1))   # (B, C_in, T)
    out = jax.lax.conv_general_dilated(
        x_nct,
        weight.astype(jnp.float32),                            # (C_out, C_in, K)
        window_strides=(stride,),
        padding=[(padding, padding)],
        rhs_dilation=(dilation,),
        dimension_numbers=("NCH", "OIH", "NCH"),
    )
    out = out + bias.astype(jnp.float32)[None, :, None]
    return jnp.transpose(out, (0, 2, 1))                       # (B, T_out, C_out)


if __name__ == "__main__":
    # Module hyper-params: Conv_layer(in_channels=8, out_channels=16,
    # kernel_size=3, stride=1, padding=1, dilation=1, bias=True).
    B, T, C_in, C_out, K = 2, 16, 8, 16, 3
    stride, padding, dilation = 1, 1, 1

    key = jax.random.PRNGKey(0)
    kx, kw, kb = jax.random.split(key, 3)

    x = jax.random.normal(kx, (B, T, C_in), dtype=jnp.float32)
    fan_in = C_in * K
    bound = 1.0 / (fan_in ** 0.5)
    weight = jax.random.uniform(kw, (C_out, C_in, K), jnp.float32, -bound, bound)
    bias = jax.random.uniform(kb, (C_out,), jnp.float32, -bound, bound)

    out = conv_layer_forward(
        x, weight, bias, stride=stride, padding=padding, dilation=dilation
    )
    jax.block_until_ready(out)

    ref = _reference_conv1d(
        x, weight, bias, stride=stride, padding=padding, dilation=dilation
    )
    assert out.shape == ref.shape, (out.shape, ref.shape)
    assert jnp.allclose(out, ref, atol=1e-5, rtol=1e-5), float(
        jnp.max(jnp.abs(out - ref))
    )

    print("KERNEL_OK")
</pallas_src>

<mosaic_0001>
module attributes {stable_mosaic.version = 11 : i64} {
  func.func @kernel(%arg0: i32, %arg1: i32, %arg2: memref<1x16x8xf32, #tpu.memory_space<vmem>>, %arg3: memref<1x8x8xf32, #tpu.memory_space<vmem>>, %arg4: memref<3x8x16xf32, #tpu.memory_space<vmem>>, %arg5: memref<1x16xf32, #tpu.memory_space<vmem>>, %arg6: memref<1x16x16xf32, #tpu.memory_space<vmem>>, %arg7: memref<24x8xf32, #tpu.memory_space<vmem>>) attributes {dimension_semantics = [#tpu.dimension_semantics<parallel>, #tpu.dimension_semantics<parallel>], iteration_bounds = array<i64: 2, 1>, scalar_prefetch = 0 : i64, scratch_operands = 1 : i64, tpu.core_type = #tpu.core_type<tc>, window_params = [{transform_indices = @transform_0, window_bounds = array<i64: 1, 16, 8>}, {transform_indices = @transform_1, window_bounds = array<i64: 1, 8, 8>}, {pipeline_mode = #tpu.pipeline_mode<synchronous>, transform_indices = @transform_2, window_bounds = array<i64: 3, 8, 16>}, {pipeline_mode = #tpu.pipeline_mode<synchronous>, transform_indices = @transform_3, window_bounds = array<i64: 1, 16>}, {transform_indices = @transform_4, window_bounds = array<i64: 1, 16, 16>}]} {
    %c0 = arith.constant 0 : index
    %c0_0 = arith.constant 0 : index
    %c0_1 = arith.constant 0 : index
    %0 = vector.load %arg2[%c0, %c0_0, %c0_1] : memref<1x16x8xf32, #tpu.memory_space<vmem>>, vector<1x16x8xf32>
    %1 = vector.shape_cast %0 : vector<1x16x8xf32> to vector<16x8xf32>
    %c0_2 = arith.constant 0 : index
    %c0_3 = arith.constant 0 : index
    %2 = vector.load %arg7[%c0_2, %c0_3] : memref<24x8xf32, #tpu.memory_space<vmem>>, vector<16x8xf32>
    tpu.vector_store %arg7[%c0_2, %c0_3], %1 {strides = array<i32>} : memref<24x8xf32, #tpu.memory_space<vmem>>, vector<16x8xf32>,
    %c0_4 = arith.constant 0 : index
    %c0_5 = arith.constant 0 : index
    %c0_6 = arith.constant 0 : index
    %3 = vector.load %arg3[%c0_4, %c0_5, %c0_6] : memref<1x8x8xf32, #tpu.memory_space<vmem>>, vector<1x8x8xf32>
    %4 = vector.shape_cast %3 : vector<1x8x8xf32> to vector<8x8xf32>
    %c16 = arith.constant 16 : index
    %c0_7 = arith.constant 0 : index
    %5 = vector.load %arg7[%c16, %c0_7] : memref<24x8xf32, #tpu.memory_space<vmem>>, vector<8x8xf32>
    tpu.vector_store %arg7[%c16, %c0_7], %4 {strides = array<i32>} : memref<24x8xf32, #tpu.memory_space<vmem>>, vector<8x8xf32>,
    %c0_8 = arith.constant 0 : index
    %c0_9 = arith.constant 0 : index
    %6 = vector.load %arg7[%c0_8, %c0_9] : memref<24x8xf32, #tpu.memory_space<vmem>>, vector<16x8xf32>
    %c0_10 = arith.constant 0 : index
    %c0_11 = arith.constant 0 : index
    %c0_12 = arith.constant 0 : index
    %7 = vector.load %arg4[%c0_10, %c0_11, %c0_12] : memref<3x8x16xf32, #tpu.memory_space<vmem>>, vector<1x8x16xf32>
    %8 = vector.shape_cast %7 : vector<1x8x16xf32> to vector<8x16xf32>
    %cst = arith.constant dense<0.000000e+00> : vector<16x16xf32>
    %9 = tpu.matmul %6, %8, %cst {dimension_numbers = #tpu.dot_dimension_numbers<[1], [0], [0], [1], [0, 0, 1, 1], [], []>} : vector<16x8xf32>, vector<8x16xf32>, vector<16x16xf32> -> vector<16x16xf32>
    %c1 = arith.constant 1 : index
    %c0_13 = arith.constant 0 : index
    %10 = vector.load %arg7[%c1, %c0_13] : memref<24x8xf32, #tpu.memory_space<vmem>>, vector<16x8xf32>
    %c1_14 = arith.constant 1 : index
    %c0_15 = arith.constant 0 : index
    %c0_16 = arith.constant 0 : index
    %11 = vector.load %arg4[%c1_14, %c0_15, %c0_16] : memref<3x8x16xf32, #tpu.memory_space<vmem>>, vector<1x8x16xf32>
    %12 = vector.shape_cast %11 : vector<1x8x16xf32> to vector<8x16xf32>
    %cst_17 = arith.constant dense<0.000000e+00> : vector<16x16xf32>
    %13 = tpu.matmul %10, %12, %cst_17 {dimension_numbers = #tpu.dot_dimension_numbers<[1], [0], [0], [1], [0, 0, 1, 1], [], []>} : vector<16x8xf32>, vector<8x16xf32>, vector<16x16xf32> -> vector<16x16xf32>
    %14 = arith.addf %9, %13 : vector<16x16xf32>
    %c2 = arith.constant 2 : index
    %c0_18 = arith.constant 0 : index
    %15 = vector.load %arg7[%c2, %c0_18] : memref<24x8xf32, #tpu.memory_space<vmem>>, vector<16x8xf32>
    %c2_19 = arith.constant 2 : index
    %c0_20 = arith.constant 0 : index
    %c0_21 = arith.constant 0 : index
    %16 = vector.load %arg4[%c2_19, %c0_20, %c0_21] : memref<3x8x16xf32, #tpu.memory_space<vmem>>, vector<1x8x16xf32>
    %17 = vector.shape_cast %16 : vector<1x8x16xf32> to vector<8x16xf32>
    %cst_22 = arith.constant dense<0.000000e+00> : vector<16x16xf32>
    %18 = tpu.matmul %15, %17, %cst_22 {dimension_numbers = #tpu.dot_dimension_numbers<[1], [0], [0], [1], [0, 0, 1, 1], [], []>} : vector<16x8xf32>, vector<8x16xf32>, vector<16x16xf32> -> vector<16x16xf32>
    %19 = arith.addf %14, %18 : vector<16x16xf32>
    %c0_23 = arith.constant 0 : index
    %c0_24 = arith.constant 0 : index
    %20 = vector.load %arg5[%c0_23, %c0_24] : memref<1x16xf32, #tpu.memory_space<vmem>>, vector<1x16xf32>
    %21 = vector.broadcast %20 : vector<1x16xf32> to vector<16x16xf32>
    %22 = arith.addf %19, %21 : vector<16x16xf32>
    %c0_25 = arith.constant 0 : index
    %c0_26 = arith.constant 0 : index
    %c0_27 = arith.constant 0 : index
    %23 = vector.load %arg6[%c0_25, %c0_26, %c0_27] : memref<1x16x16xf32, #tpu.memory_space<vmem>>, vector<1x16x16xf32>
    %24 = vector.shape_cast %23 : vector<1x16x16xf32> to vector<16x16xf32>
    %25 = vector.shape_cast %22 : vector<16x16xf32> to vector<1x16x16xf32>
    tpu.vector_store %arg6[%c0_25, %c0_26, %c0_27], %25 {strides = array<i32>} : memref<1x16x16xf32, #tpu.memory_space<vmem>>, vector<1x16x16xf32>,
    return
  }
  func.func @transform_0(%arg0: i32, %arg1: i32) -> (i32, i32, i32) {
    %c0_i32 = arith.constant 0 : i32
    %c0_i32_0 = arith.constant 0 : i32
    return %arg0, %arg1, %c0_i32 : i32, i32, i32
  }
  func.func @transform_1(%arg0: i32, %arg1: i32) -> (i32, i32, i32) {
    %c1_i32 = arith.constant 1 : i32
    %0 = arith.addi %arg1, %c1_i32 : i32
    %c2_i32 = arith.constant 2 : i32
    %1 = arith.muli %0, %c2_i32 : i32
    %c0_i32 = arith.constant 0 : i32
    %c0_i32_0 = arith.constant 0 : i32
    return %arg0, %1, %c0_i32 : i32, i32, i32
  }
  func.func @transform_2(%arg0: i32, %arg1: i32) -> (i32, i32, i32) {
    %c0_i32 = arith.constant 0 : i32
    %c0_i32_0 = arith.constant 0 : i32
    %c0_i32_1 = arith.constant 0 : i32
    %c0_i32_2 = arith.constant 0 : i32
    return %c0_i32, %c0_i32_0, %c0_i32_1 : i32, i32, i32
  }
  func.func @transform_3(%arg0: i32, %arg1: i32) -> (i32, i32) {
    %c0_i32 = arith.constant 0 : i32
    %c0_i32_0 = arith.constant 0 : i32
    %c0_i32_1 = arith.constant 0 : i32
    return %c0_i32, %c0_i32_0 : i32, i32
  }
  func.func @transform_4(%arg0: i32, %arg1: i32) -> (i32, i32, i32) {
    %c0_i32 = arith.constant 0 : i32
    %c0_i32_0 = arith.constant 0 : i32
    return %arg0, %arg1, %c0_i32 : i32, i32, i32
  }
}

</mosaic_0001>

<bundles_post_ra>
// kernel: conv_layer_forward.1
= control target key start
LH: loop header
LB: loop body
LE: loop exit
PB: predicated region body
PF: predicated region fallthrough
CT: control target
= control target key end

     0   :  { %9 = vsyncpa [#allocation4], 0  ;;  %s1040_s0 = inlined_call_operand.vmem [shape: f32[2,24,8], index: 0, kind: input, shape index: {}, may-alias: {0,1}]   ;;  %s1041_s1 = inlined_call_operand.vmem [shape: f32[2,24,8], index: 1, kind: input, shape index: {}, may-alias: {0,1}]   ;;  %s1042_s2 = inlined_call_operand.vmem [shape: f32[3,8,16], index: 2, kind: input, shape index: {}]   ;;  %s1043_s3 = inlined_call_operand.vmem [shape: f32[1,16], index: 3, kind: input, shape index: {}]   ;;  %s1044_s4 = inlined_call_operand.hbm [shape: f32[2,16,16], index: 4, kind: output, shape index: {}]  }
   0x1   :  { %11 = vsyncpa [#allocation4 + $0x1], 0  ;;  %s901_s15 = smov 0   ;;  %s903_s16 = smov 0  }
   0x2   :  { %s905_s17 = smov 0   ;;  %s907_s18 = smov 0  }
   0x3   :  { %s909_s19 = smov 0   ;;  %s911_s20 = smov 0  }
   0x4 LB: > { %s680_s21 = sadd.s32 4294967295, %s871_s20   ;;  %s681_s22 = sadd.s32 4294967294, %s871_s20   ;;  %s871_s20 = sphi %s911_s20, %s17_s20   ;;  %s867_s19 = sphi %s909_s19, %s1051_s19   ;;  %s863_s18 = sphi %s907_s18, %s1050_s18   ;;  %s859_s17 = sphi %s905_s17, %s1049_s17   ;;  %s855_s16 = sphi %s903_s16, %s1048_s16   ;;  %s851_s15 = sphi %s901_s15, %s1047_s15  }
   0x5   : > { %s29_s23 = sadd.s32 1, %s867_s19  ;;  %s140_s24 = sadd.s32 1, %s859_s17 }
   0x6   : > { %p31_p0 = scmp.ge.s32.totalorder %s29_s23, 2  ;;  %p150_p1 = scmp.ne.s32.totalorder %s859_s17, %s855_s16 }
   0x7   : > { %p151_p2 = scmp.eq.s32.totalorder %s680_s21, 1  ;;  %p156_p3 = scmp.ne.s32.totalorder %s855_s16, %s851_s15 }
   0x8   : > { %s1053_s23 = smov (%p31_p0, %s29_s23), 0  ;;  %p157_p5 = scmp.eq.s32.totalorder %s681_s22, 1 }
   0x9   : > { %p941_p4 = por %p151_p2, %p150_p1  ;;  %s135_s26 = ssub.s32 %s867_s19, %s1053_s23 }
   0xa   : > { %p684_p6 = scmp.ge.s32.totalorder %s871_s20, 1  ;;  %p138_p7 = scmp.eq.s32.totalorder %s135_s26, 0 }
   0xb   : > { %p948_p8 = por %p157_p5, %p156_p3  ;;  %p217_p9 = scmp.lt.s32.totalorder %s871_s20, 3 }
   0xc   : > { %s954_s28 = scalar_select %p138_p7, %s859_s17, %s140_s24  }
   0xd   : > { %p218_p10 = pnand %p684_p6, %p217_p9 }
   0xe   : > { %v301_v0 = vld [vmem:[%s1042_s2] sm:$0xff] (!%p218_p10)  ;;  %p266_p11 = scmp.lt.s32.totalorder (!%p218_p10), %s863_s18, 1  ;;  %v693_v1 = vld [vmem:[%s1042_s2 + $0x10] sm:$0xff] (!%p218_p10)  ;;  %v688_v2 = vld [vmem:[%s1042_s2 + $0x8] sm:$0xff] (!%p218_p10)  ;;  %vm294_vm0 = vcmask (!%p218_p10), 64512   ;;  %s258_s26 = sand.u32 (!%p218_p10), 1, %s855_s16  }
   0xf   : > { %221 = sbr.rel (%p218_p10) target bundleno = 277 (0x115), region = 36  ;;  %719 = vmatprep.subr.mxu0 (!%p218_p10), %v301_v0  ;;  %714 = vmatprep.subr.mxu1 (!%p218_p10), %v688_v2  ;;  %s685_s29 = sshll.u32 (!%p218_p10), %s258_s26, 4  ;;  %v696_v15 = vld [vmem:[%s1043_s3] ss:$0 sm:$0xff] (!%p218_p10)  ;;  %vm564_vm1 = vcmask (!%p218_p10), 130048  }
  0x10   : > { %720 = vmatpush3.msra.mxu0 (!%p218_p10), %v301_v0  ;;  %715 = vmatpush3.msra.mxu1 (!%p218_p10), %v688_v2  ;;  %s260_s6 = scalar_lea.vmem (!%p218_p10), [#allocation3], %s685_s29  ;;  %s704_s8 = sshll.u32 (!%p218_p10), %s863_s18, 8 }
  0x11   : > { %724 = vmatprep.subr.mxu0 (!%p218_p10), %v693_v1  ;;  %s583_s7 = sshll.u32 (!%p218_p10), %s260_s6, 4  ;;  %s990_s11 = scalar_lea.hbm (!%p218_p10), %s1044_s4, %s704_s8  ;;  %s992_s7 = int_to_ptr.vmem [resolvable:$true] %s583_s7 }
  0x12   : > { %s994_s12 = scalar_lea.sflag (!%p218_p10), [#allocation4], %s258_s26 }
  0x16   : > { %s267_s9 = scalar_select %p266_p11, %s863_s18, 1 }
  0x17   : > { %s793_s18 = scalar_lea.vmem %s992_s7, 256 }
  0x18   : > { %s733_s10 = smul.u32 24, %s267_s9  ;;  %p794_p12 = scmp.ne.s32.totalorder %s992_s7, %s793_s18 }
  0x1a   : > { %s273_s13 = scalar_lea.vmem %s1040_s0, %s733_s10  ;;  %s703_s14 = sadd.s32 16, %s733_s10 }
  0x1b   : > { %v292_v3 = vld [vmem:[%s273_s13] sm:$0xff]  ;;  %v293_v4 = vld [vmem:[%s273_s13 + $0x8] sm:$0xff]  ;;  %s288_s24 = scalar_lea.vmem %s1041_s1, %s703_s14  ;;  %p795_p13 = pnand %p794_p12, %p941_p4 }
  0x1c   : > { %295 = vst.msk [vmem:[#allocation2] sm:$0xff] %vm294_vm0, %v292_v3  ;;  %296 = vst.msk [vmem:[#allocation2 + $0x8] sm:$0xff] %vm294_vm0, %v293_v4  ;;  %v297_v5 = vld [vmem:[%s288_s24] sm:$0xff]  ;;  %s873_s13 = smov [#allocation3]  }
  0x1d   : > { %298 = vst.msk [vmem:[#allocation2 + $0x10] sm:$0xff] %vm294_vm0, %v297_v5  ;;  %p796_p0 = pneg %p795_p13  ;;  %s797_s14 = sshll.u32 %s873_s13, 4  ;;  %s798_s14 = int_to_ptr.vmem [resolvable:$false] %s797_s14 }
  0x1e   : > { %s799_s21 = scalar_lea.vmem %s798_s14, 512  ;;  %p800_p1 = scmp.lt.s32.totalorder %s992_s7, %s798_s14 }
  0x1f   : > { %p801_p2 = scmp.lt.s32.totalorder %s799_s21, %s793_s18 }
  0x21   : > { %p802_p3 = por %p801_p2, %p800_p1 }
  0x23   : > { %v299_v6 = vld [vmem:[#allocation2] sm:$0xff]  ;;  %v300_v7 = vld [vmem:[#allocation2 + $0x8] sm:$0xff]  ;;  %p803_p5 = pnand %p802_p3, %p796_p0 }
  0x24   : > { %v302_v8 = vld [vmem:[#allocation2 + $0x1] sm:$0xff]  ;;  %721 = vmatprep.mubr.msk.f32.mxu0 %vm294_vm0, %v299_v6  ;;  %v303_v9 = vld [vmem:[#allocation2 + $0x9] sm:$0xff] }
  0x25   : > { %716 = vmatprep.mubr.msk.f32.mxu1 %vm294_vm0, %v302_v8  ;;  %v468_v10 = vld [vmem:[#allocation2 + $0x2] sm:$0xff]  ;;  %722 = vmatmul.mubr.msk.f32.vlgmr.msra.gmra.mrb[0].mxu0 %vm294_vm0, %v300_v7  ;;  %v469_v11 = vld [vmem:[#allocation2 + $0xa] sm:$0xff] }
  0x26   : > { %717 = vmatmul.mubr.msk.f32.vlgmr.msra.gmra.mrb[0].mxu1 %vm294_vm0, %v303_v9  ;;  %725 = vmatpush3.msra.mxu0 %v693_v1 }
  0x27   : > { %726 = vmatprep.mubr.msk.f32.mxu0 %vm294_vm0, %v468_v10 }
  0x2d   : > { %727 = vmatmul.mubr.msk.f32.vlgmr.msra.gmra.mrb[0].mxu0 %vm294_vm0, %v469_v11 }
  0xf9   : > { %v718_v12 = vpop.f32.mrb[0].mxu1 }
  0xfa   : > { %v378_v13 = vpop.f32.mrb[1].mxu1 }
 0x100   : > { %v728_v14 = vpop.f32.mrb[0].mxu0 }
 0x101   : > { %v729_v16 = vadd.f32 %v728_v14, %v718_v12  ;;  %v544_v17 = vpop.f32.mrb[1].mxu0 }
 0x102   : > { %v730_v18 = vadd.f32 %v544_v17, %v378_v13 }
 0x103   : > { %v563_v19 = vadd.f32 %v729_v16, %v696_v15 }
 0x104   : > { %v562_v20 = vadd.f32 %v730_v18, %v696_v15 }
 0x105   : > { %566 = vst.msk [vmem:[%s260_s6 + $0x8] sm:$0xff] %vm564_vm1, %v563_v19 }
 0x106   : > { %565 = vst.msk [vmem:[%s260_s6] sm:$0xff] %vm564_vm1, %v562_v20 }
 0x107   : > { %806 = shalt.err (!%p803_p5)
}
 0x108   : > { %s807_s22 = scalar_lea.hbm %s990_s11, 256  ;;  %s811_s29 = scalar_lea.hbm %s1044_s4, 512 }
 0x109   : > { %p808_p6 = scmp.ne.s32.totalorder %s990_s11, %s807_s22  ;;  %p812_p10 = scmp.lt.u32.totalorder %s990_s11, %s1044_s4 }
 0x10a   : > { %p813_p11 = scmp.lt.u32.totalorder %s811_s29, %s807_s22  ;;  %p815_p13 = scmp.lt.u32.totalorder %s807_s22, %s990_s11 }
 0x10b   : > { %p809_p7 = pnand %p808_p6, %p941_p4 }
 0x10c   : > { %p814_p12 = por %p813_p11, %p812_p10 }
 0x10d   : > { %p810_p9 = pneg %p809_p7 }
 0x10e   : > { %p816_p0 = por %p815_p13, %p814_p12 }
 0x110   : > { %p817_p1 = pnand %p816_p0, %p810_p9 }
 0x112   : > { %820 = shalt.err (!%p817_p1)
}
 0x113   : > { %s874_s6 = smov 128   ;;  %s875_s8 = smov 8  }
 0x114   : > { %735 = dma.vmem_to_hbm [thread:$0]  (%p941_p4), %s992_s7, 256, %s990_s11, %s994_s12, %s874_s6, %s874_s6, %s875_s8  }
 0x115 PF: > { %p742_p2 = scmp.ge.s32.totalorder %s871_s20, 2  ;;  %s598_s9 = sand.u32 1, %s851_s15  }
 0x116   : > { %s599_s10 = scalar_lea.sflag [#allocation4], %s598_s9 }
 0x117   : > { %p738_p3 = pnand %p742_p2, %p948_p8 }
 0x119   : > { %846 = dma.done.wait (!%p738_p3), %s599_s10, 256  }
 0x11a   : > { %848 = vsyncadd (!%p738_p3), %s599_s10, 4294967040  ;;  %s17_s20 = sadd.s32 1, %s871_s20   ;;  %s1047_s15 = smov %s855_s16 }
 0x11b   : > { %p14_p5 = scmp.ge.s32.totalorder %s17_s20, 4   ;;  %s1048_s16 = smov %s859_s17 }
 0x11c   : > { %s1049_s17 = smov %s954_s28  ;;  %s1050_s18 = smov %s867_s19 }
 0x11d   : > { %s1051_s19 = smov %s1053_s23  ;;  %16 = sbr.rel (!%p14_p5) target bundleno = 4 (0x4), region = 76 }
 0x124   :  { %604 = vsyncpa [#allocation4], 1 }
 0x125   :  { %606 = vsyncpa [#allocation4 + $0x1], 1 }

</bundles_post_ra>
